<compile_context>
chip_gen: v6e
topology: v6e:2x2x1
jax: 0.10.0
libtpu: 0.0.40
codegen_flags: <defaults>
</compile_context>

<pallas_src>
import jax
import jax.numpy as jnp
from jax import lax
from jax.experimental import pallas as pl
from jax.experimental.pallas import tpu as pltpu


def _round_up(n: int, m: int) -> int:
    return (n + m - 1) // m * m


def _pick_tile(n: int, base: int, max_tile: int):
    """Pad `n` up to `base`, pick a tile <= max_tile, re-pad to a tile multiple."""
    n_pad = _round_up(n, base)
    tile = n_pad if n_pad <= max_tile else max_tile
    n_pad = _round_up(n_pad, tile)
    return n_pad, tile


def make_fused_rnn_kernel(num_layers: int, T: int, B_tile: int, matmul_dtype):
    """Fused kernel: num_layers tanh-RNN layers + vocab-tiled linear head.

    Ref order (all 2-D, lane/sublane aligned):
      x_ref                              (T*B_tile, E_pad)   matmul_dtype
      [wx_l, wh_l, b_l] * num_layers     weights (padded); biases f32
      w_head_ref                         (H_pad, V_tile)     matmul_dtype
      b_head_ref                         (1, V_tile)         f32
      out_ref                            (T*B_tile, V_tile)  f32
      h_seq_ref                          (T*B_tile, H_pad)   f32 VMEM scratch
    Grid: (batch_tiles [parallel], vocab_tiles [arbitrary]).
    """
    unroll = max(1, min(T, 8))

    def kernel(*refs):
        x_ref = refs[0]
        layer_refs = refs[1:1 + 3 * num_layers]
        w_head_ref = refs[1 + 3 * num_layers]
        b_head_ref = refs[2 + 3 * num_layers]
        out_ref = refs[3 + 3 * num_layers]
        h_seq_ref = refs[4 + 3 * num_layers]

        H_pad = h_seq_ref.shape[1]

        # --- Recurrence: run once per batch tile (first vocab tile only). ----
        @pl.when(pl.program_id(1) == 0)
        def _recurrence():
            layer_in = x_ref[...]                       # (T*B_tile, E_pad)
            for layer in range(num_layers):
                wx = layer_refs[3 * layer][...]         # (in_pad, H_pad)
                wh = layer_refs[3 * layer + 1][...]     # (H_pad, H_pad)
                b = layer_refs[3 * layer + 2][...]      # (1, H_pad) f32

                # Input projection + bias hoisted out of the recurrence:
                # one big (T*B_tile, in) @ (in, H) MXU matmul, f32 accumulate.
                pre = jnp.dot(layer_in.astype(matmul_dtype), wx,
                              preferred_element_type=jnp.float32) + b
                # Alias: pre shares the h_seq scratch (pre[t] dead after step t).
                h_seq_ref[...] = pre

                def step(t, h_prev):
                    row = pl.multiple_of(t * B_tile, 8)       # aligned tile row
                    p_t = h_seq_ref[pl.ds(row, B_tile), :]    # pre[t]
                    h_t = jnp.tanh(
                        p_t + jnp.dot(h_prev.astype(matmul_dtype), wh,
                                      preferred_element_type=jnp.float32))
                    h_seq_ref[pl.ds(row, B_tile), :] = h_t    # overwrite pre[t]
                    return h_t

                lax.fori_loop(0, T, step,
                              jnp.zeros((B_tile, H_pad), jnp.float32),
                              unroll=unroll)
                layer_in = h_seq_ref[...]               # feeds next layer / head

        # --- Head: one (T*B_tile, H) @ (H, V_tile) matmul per vocab tile. ----
        logits = jnp.dot(h_seq_ref[...].astype(matmul_dtype), w_head_ref[...],
                         preferred_element_type=jnp.float32) + b_head_ref[...]
        out_ref[...] = logits.astype(out_ref.dtype)

    return kernel


def init_params(key, vocab_size, n_embd, hidden_size, num_layers):
    """Deterministic parameter init mirroring the PyTorch module's shapes."""
    n_keys = 1 + 4 * num_layers + 2
    keys = list(jax.random.split(key, n_keys))

    emb = jax.random.normal(keys.pop(0), (vocab_size, n_embd), jnp.float32)

    rnn_layers = []
    bound = 1.0 / (hidden_size ** 0.5)
    in_size = n_embd
    for _ in range(num_layers):
        wx = jax.random.uniform(keys.pop(0), (in_size, hidden_size),
                                jnp.float32, -bound, bound)
        wh = jax.random.uniform(keys.pop(0), (hidden_size, hidden_size),
                                jnp.float32, -bound, bound)
        b_ih = jax.random.uniform(keys.pop(0), (1, hidden_size),
                                  jnp.float32, -bound, bound)
        b_hh = jax.random.uniform(keys.pop(0), (1, hidden_size),
                                  jnp.float32, -bound, bound)
        rnn_layers.append((wx, wh, b_ih + b_hh))   # fold biases (same math)
        in_size = hidden_size

    hb = 1.0 / (hidden_size ** 0.5)
    w_head = jax.random.uniform(keys.pop(0), (hidden_size, vocab_size),
                                jnp.float32, -hb, hb)
    b_head = jax.random.uniform(keys.pop(0), (1, vocab_size),
                                jnp.float32, -hb, hb)

    return {"emb": emb, "rnn_layers": rnn_layers, "head": (w_head, b_head)}


def rnn_forward(idx, params, *, matmul_dtype=jnp.bfloat16,
                max_batch_tile=256, max_vocab_tile=512):
    """idx: (B, T) int32 -> logits: (B, T, vocab) float32 (batch-first)."""
    emb = params["emb"]
    B, T = idx.shape
    E = emb.shape[1]
    H = params["rnn_layers"][0][1].shape[0]
    V = params["head"][0].shape[1]
    num_layers = len(params["rnn_layers"])

    E_pad = _round_up(E, 128)
    H_pad = _round_up(H, 128)
    B_pad, B_tile = _pick_tile(B, 8, max_batch_tile)     # batch grid axis
    V_pad, V_tile = _pick_tile(V, 128, max_vocab_tile)   # vocab grid axis
    n_bt = B_pad // B_tile
    n_vt = V_pad // V_tile
    rows = T * B_tile

    # Embedding lookup kept as XLA glue (see TODO at top of file).
    x = jnp.take(emb, idx, axis=0).astype(jnp.float32)               # (B, T, E)
    x = jnp.pad(x, ((0, B_pad - B), (0, 0), (0, E_pad - E)))         # zero pad
    x = x.reshape(n_bt, B_tile, T, E_pad).transpose(0, 2, 1, 3)      # time-major
    x = x.reshape(n_bt, rows, E_pad).astype(matmul_dtype)

    ins = [x]
    in_specs = [pl.BlockSpec((None, rows, E_pad), lambda i, j: (i, 0, 0))]

    in_pad = E_pad
    for (wx, wh, b) in params["rnn_layers"]:
        in_size = wx.shape[0]
        ins.append(jnp.pad(wx, ((0, in_pad - in_size),
                                (0, H_pad - H))).astype(matmul_dtype))
        in_specs.append(pl.BlockSpec((in_pad, H_pad), lambda i, j: (0, 0)))
        ins.append(jnp.pad(wh, ((0, H_pad - H),
                                (0, H_pad - H))).astype(matmul_dtype))
        in_specs.append(pl.BlockSpec((H_pad, H_pad), lambda i, j: (0, 0)))
        ins.append(jnp.pad(b, ((0, 0), (0, H_pad - H))).astype(jnp.float32))
        in_specs.append(pl.BlockSpec((1, H_pad), lambda i, j: (0, 0)))
        in_pad = H_pad

    w_head, b_head = params["head"]
    ins.append(jnp.pad(w_head, ((0, H_pad - H),
                                (0, V_pad - V))).astype(matmul_dtype))
    in_specs.append(pl.BlockSpec((H_pad, V_tile), lambda i, j: (0, j)))
    ins.append(jnp.pad(b_head, ((0, 0), (0, V_pad - V))).astype(jnp.float32))
    in_specs.append(pl.BlockSpec((1, V_tile), lambda i, j: (0, j)))

    # VMEM budget: resident weights + double-buffered tiles + scratch + slack.
    mm_bytes = jnp.dtype(matmul_dtype).itemsize
    w_bytes, ip = 0, E_pad
    for _ in range(num_layers):
        w_bytes += (ip * H_pad + H_pad * H_pad) * mm_bytes + H_pad * 4
        ip = H_pad
    tile_bytes = (rows * E_pad * mm_bytes                 # x tile
                  + H_pad * V_tile * mm_bytes + V_tile * 4  # head tile
                  + rows * V_tile * 4)                    # logits tile
    scratch_bytes = rows * H_pad * 4
    est = 2 * w_bytes + 2 * tile_bytes + scratch_bytes + (8 << 20)
    vmem_limit = int(min(max(est, 32 << 20), 100 << 20))

    out = pl.pallas_call(
        make_fused_rnn_kernel(num_layers, T, B_tile, matmul_dtype),
        out_shape=jax.ShapeDtypeStruct((n_bt, rows, V_pad), jnp.float32),
        grid=(n_bt, n_vt),
        in_specs=in_specs,
        out_specs=pl.BlockSpec((None, rows, V_tile), lambda i, j: (i, 0, j)),
        scratch_shapes=[pltpu.VMEM((rows, H_pad), jnp.float32)],
        compiler_params=pltpu.CompilerParams(
            dimension_semantics=("parallel", "arbitrary"),
            vmem_limit_bytes=vmem_limit),
    )(*ins)

    # (n_bt, T*B_tile, V_pad) -> (B, T, V), dropping batch/vocab padding.
    out = out.reshape(n_bt, T, B_tile, V_pad).transpose(0, 2, 1, 3)
    out = out.reshape(B_pad, T, V_pad)[:B, :, :V]
    return out


def rnn_forward_ref(idx, params):
    """Pure-JAX reference (mirrors torch semantics: h0 = 0, tanh RNN)."""
    x = jnp.take(params["emb"], idx, axis=0).astype(jnp.float32)  # (B, T, E)
    h_seq = x
    for (wx, wh, b) in params["rnn_layers"]:
        B = h_seq.shape[0]
        H = wh.shape[0]

        def step(h_prev, x_t):
            h_t = jnp.tanh(x_t @ wx + h_prev @ wh + b)
            return h_t, h_t

        _, outs = lax.scan(step, jnp.zeros((B, H), jnp.float32),
                           jnp.transpose(h_seq, (1, 0, 2)))
        h_seq = jnp.transpose(outs, (1, 0, 2))
    w_head, b_head = params["head"]
    return h_seq @ w_head + b_head


if __name__ == "__main__":
    root = jax.random.PRNGKey(0)
    k1, k2, k3 = jax.random.split(root, 3)

    # Config 1: module defaults (1 layer), f32 matmuls -> tight match to ref.
    vocab_size, n_embd, hidden_size, num_layers = 32, 16, 32, 1
    batch, time = 2, 8
    params = init_params(k1, vocab_size, n_embd, hidden_size, num_layers)
    idx = jax.random.randint(k2, (batch, time), 0, vocab_size, jnp.int32)

    logits = jax.block_until_ready(
        rnn_forward(idx, params, matmul_dtype=jnp.float32))
    ref = rnn_forward_ref(idx, params)
    assert logits.shape == (batch, time, vocab_size)
    assert jnp.allclose(logits, ref, atol=1e-4, rtol=1e-4)

    # Config 2: default bf16 matmul operands (f32 accumulation) -> looser tol.
    logits_bf = jax.block_until_ready(rnn_forward(idx, params))
    assert jnp.allclose(logits_bf, ref, atol=1e-1, rtol=5e-2)

    # Config 3: 2 layers, vocab and batch larger than one tile -> grid (2, 2):
    # exercises pl.when gating, scratch reuse across vocab tiles and the
    # parallel batch axis.
    vocab3, batch3 = 600, 12
    params3 = init_params(k3, vocab3, n_embd, hidden_size, 2)
    idx3 = jax.random.randint(k2, (batch3, time), 0, vocab3, jnp.int32)
    logits3 = jax.block_until_ready(
        rnn_forward(idx3, params3, matmul_dtype=jnp.float32, max_batch_tile=8))
    ref3 = rnn_forward_ref(idx3, params3)
    assert logits3.shape == (batch3, time, vocab3)
    assert jnp.allclose(logits3, ref3, atol=1e-4, rtol=1e-4)

    print("KERNEL_OK")
</pallas_src>

<mosaic_0001>
module attributes {stable_mosaic.version = 11 : i64} {
  func.func @kernel(%arg0: i32, %arg1: i32, %arg2: memref<1x64x128xf32, #tpu.memory_space<vmem>>, %arg3: memref<128x128xf32, #tpu.memory_space<vmem>>, %arg4: memref<128x128xf32, #tpu.memory_space<vmem>>, %arg5: memref<1x128xf32, #tpu.memory_space<vmem>>, %arg6: memref<128x128xf32, #tpu.memory_space<vmem>>, %arg7: memref<1x128xf32, #tpu.memory_space<vmem>>, %arg8: memref<1x64x128xf32, #tpu.memory_space<vmem>>, %arg9: memref<64x128xf32, #tpu.memory_space<vmem>>) attributes {dimension_semantics = [#tpu.dimension_semantics<parallel>, #tpu.dimension_semantics<arbitrary>], iteration_bounds = array<i64: 1, 1>, scalar_prefetch = 0 : i64, scratch_operands = 1 : i64, tpu.core_type = #tpu.core_type<tc>, window_params = [{transform_indices = @transform_0, window_bounds = array<i64: 1, 64, 128>}, {pipeline_mode = #tpu.pipeline_mode<synchronous>, transform_indices = @transform_1, window_bounds = array<i64: 128, 128>}, {pipeline_mode = #tpu.pipeline_mode<synchronous>, transform_indices = @transform_2, window_bounds = array<i64: 128, 128>}, {pipeline_mode = #tpu.pipeline_mode<synchronous>, transform_indices = @transform_3, window_bounds = array<i64: 1, 128>}, {transform_indices = @transform_4, window_bounds = array<i64: 128, 128>}, {transform_indices = @transform_5, window_bounds = array<i64: 1, 128>}, {transform_indices = @transform_6, window_bounds = array<i64: 1, 64, 128>}]} {
    %c0_i32 = arith.constant 0 : i32
    %0 = arith.cmpi eq, %arg1, %c0_i32 : i32
    %1 = arith.extui %0 : i1 to i32
    %c0_i32_0 = arith.constant 0 : i32
    %2 = arith.cmpi ne, %1, %c0_i32_0 : i32
    scf.if %2 {
      %c0_9 = arith.constant 0 : index
      %c0_10 = arith.constant 0 : index
      %c0_11 = arith.constant 0 : index
      %12 = vector.load %arg2[%c0_9, %c0_10, %c0_11] : memref<1x64x128xf32, #tpu.memory_space<vmem>>, vector<1x64x128xf32>
      %13 = vector.shape_cast %12 : vector<1x64x128xf32> to vector<64x128xf32>
      %c0_12 = arith.constant 0 : index
      %c0_13 = arith.constant 0 : index
      %14 = vector.load %arg3[%c0_12, %c0_13] : memref<128x128xf32, #tpu.memory_space<vmem>>, vector<128x128xf32>
      %c0_14 = arith.constant 0 : index
      %c0_15 = arith.constant 0 : index
      %15 = vector.load %arg4[%c0_14, %c0_15] : memref<128x128xf32, #tpu.memory_space<vmem>>, vector<128x128xf32>
      %c0_16 = arith.constant 0 : index
      %c0_17 = arith.constant 0 : index
      %16 = vector.load %arg5[%c0_16, %c0_17] : memref<1x128xf32, #tpu.memory_space<vmem>>, vector<1x128xf32>
      %cst_18 = arith.constant dense<0.000000e+00> : vector<64x128xf32>
      %17 = tpu.matmul %13, %14, %cst_18 {dimension_numbers = #tpu.dot_dimension_numbers<[1], [0], [0], [1], [0, 0, 1, 1], [], []>} : vector<64x128xf32>, vector<128x128xf32>, vector<64x128xf32> -> vector<64x128xf32>
      %18 = vector.broadcast %16 : vector<1x128xf32> to vector<64x128xf32>
      %19 = arith.addf %17, %18 : vector<64x128xf32>
      %c0_19 = arith.constant 0 : index
      %c0_20 = arith.constant 0 : index
      %20 = vector.load %arg9[%c0_19, %c0_20] : memref<64x128xf32, #tpu.memory_space<vmem>>, vector<64x128xf32>
      tpu.vector_store %arg9[%c0_19, %c0_20], %19 {strides = array<i32>} : memref<64x128xf32, #tpu.memory_space<vmem>>, vector<64x128xf32>,
      %cst_21 = arith.constant 0.000000e+00 : f32
      %21 = vector.broadcast %cst_21 : f32 to vector<8x128xf32>
      %c0_i32_22 = arith.constant 0 : i32
      %c8_i32 = arith.constant 8 : i32
      %22 = arith.muli %c0_i32_22, %c8_i32 : i32
      %23 = tpu.assume_multiple %22, 8 : i32
      %24 = arith.index_cast %23 : i32 to index
      %c0_23 = arith.constant 0 : index
      %25 = vector.load %arg9[%24, %c0_23] : memref<64x128xf32, #tpu.memory_space<vmem>>, vector<8x128xf32>
      %cst_24 = arith.constant dense<0.000000e+00> : vector<8x128xf32>
      %26 = tpu.matmul %21, %15, %cst_24 {dimension_numbers = #tpu.dot_dimension_numbers<[1], [0], [0], [1], [0, 0, 1, 1], [], []>} : vector<8x128xf32>, vector<128x128xf32>, vector<8x128xf32> -> vector<8x128xf32>
      %27 = arith.addf %25, %26 : vector<8x128xf32>
      %28 = math.tanh %27 : vector<8x128xf32>
      %29 = arith.index_cast %23 : i32 to index
      %c0_25 = arith.constant 0 : index
      %30 = vector.load %arg9[%29, %c0_25] : memref<64x128xf32, #tpu.memory_space<vmem>>, vector<8x128xf32>
      tpu.vector_store %arg9[%29, %c0_25], %28 {strides = array<i32>} : memref<64x128xf32, #tpu.memory_space<vmem>>, vector<8x128xf32>,
      %c1_i32 = arith.constant 1 : i32
      %c8_i32_26 = arith.constant 8 : i32
      %31 = arith.muli %c1_i32, %c8_i32_26 : i32
      %32 = tpu.assume_multiple %31, 8 : i32
      %33 = arith.index_cast %32 : i32 to index
      %c0_27 = arith.constant 0 : index
      %34 = vector.load %arg9[%33, %c0_27] : memref<64x128xf32, #tpu.memory_space<vmem>>, vector<8x128xf32>
      %cst_28 = arith.constant dense<0.000000e+00> : vector<8x128xf32>
      %35 = tpu.matmul %28, %15, %cst_28 {dimension_numbers = #tpu.dot_dimension_numbers<[1], [0], [0], [1], [0, 0, 1, 1], [], []>} : vector<8x128xf32>, vector<128x128xf32>, vector<8x128xf32> -> vector<8x128xf32>
      %36 = arith.addf %34, %35 : vector<8x128xf32>
      %37 = math.tanh %36 : vector<8x128xf32>
      %38 = arith.index_cast %32 : i32 to index
      %c0_29 = arith.constant 0 : index
      %39 = vector.load %arg9[%38, %c0_29] : memref<64x128xf32, #tpu.memory_space<vmem>>, vector<8x128xf32>
      tpu.vector_store %arg9[%38, %c0_29], %37 {strides = array<i32>} : memref<64x128xf32, #tpu.memory_space<vmem>>, vector<8x128xf32>,
      %c2_i32 = arith.constant 2 : i32
      %c8_i32_30 = arith.constant 8 : i32
      %40 = arith.muli %c2_i32, %c8_i32_30 : i32
      %41 = tpu.assume_multiple %40, 8 : i32
      %42 = arith.index_cast %41 : i32 to index
      %c0_31 = arith.constant 0 : index
      %43 = vector.load %arg9[%42, %c0_31] : memref<64x128xf32, #tpu.memory_space<vmem>>, vector<8x128xf32>
      %cst_32 = arith.constant dense<0.000000e+00> : vector<8x128xf32>
      %44 = tpu.matmul %37, %15, %cst_32 {dimension_numbers = #tpu.dot_dimension_numbers<[1], [0], [0], [1], [0, 0, 1, 1], [], []>} : vector<8x128xf32>, vector<128x128xf32>, vector<8x128xf32> -> vector<8x128xf32>
      %45 = arith.addf %43, %44 : vector<8x128xf32>
      %46 = math.tanh %45 : vector<8x128xf32>
      %47 = arith.index_cast %41 : i32 to index
      %c0_33 = arith.constant 0 : index
      %48 = vector.load %arg9[%47, %c0_33] : memref<64x128xf32, #tpu.memory_space<vmem>>, vector<8x128xf32>
      tpu.vector_store %arg9[%47, %c0_33], %46 {strides = array<i32>} : memref<64x128xf32, #tpu.memory_space<vmem>>, vector<8x128xf32>,
      %c3_i32 = arith.constant 3 : i32
      %c8_i32_34 = arith.constant 8 : i32
      %49 = arith.muli %c3_i32, %c8_i32_34 : i32
      %50 = tpu.assume_multiple %49, 8 : i32
      %51 = arith.index_cast %50 : i32 to index
      %c0_35 = arith.constant 0 : index
      %52 = vector.load %arg9[%51, %c0_35] : memref<64x128xf32, #tpu.memory_space<vmem>>, vector<8x128xf32>
      %cst_36 = arith.constant dense<0.000000e+00> : vector<8x128xf32>
      %53 = tpu.matmul %46, %15, %cst_36 {dimension_numbers = #tpu.dot_dimension_numbers<[1], [0], [0], [1], [0, 0, 1, 1], [], []>} : vector<8x128xf32>, vector<128x128xf32>, vector<8x128xf32> -> vector<8x128xf32>
      %54 = arith.addf %52, %53 : vector<8x128xf32>
      %55 = math.tanh %54 : vector<8x128xf32>
      %56 = arith.index_cast %50 : i32 to index
      %c0_37 = arith.constant 0 : index
      %57 = vector.load %arg9[%56, %c0_37] : memref<64x128xf32, #tpu.memory_space<vmem>>, vector<8x128xf32>
      tpu.vector_store %arg9[%56, %c0_37], %55 {strides = array<i32>} : memref<64x128xf32, #tpu.memory_space<vmem>>, vector<8x128xf32>,
      %c4_i32 = arith.constant 4 : i32
      %c8_i32_38 = arith.constant 8 : i32
      %58 = arith.muli %c4_i32, %c8_i32_38 : i32
      %59 = tpu.assume_multiple %58, 8 : i32
      %60 = arith.index_cast %59 : i32 to index
      %c0_39 = arith.constant 0 : index
      %61 = vector.load %arg9[%60, %c0_39] : memref<64x128xf32, #tpu.memory_space<vmem>>, vector<8x128xf32>
      %cst_40 = arith.constant dense<0.000000e+00> : vector<8x128xf32>
      %62 = tpu.matmul %55, %15, %cst_40 {dimension_numbers = #tpu.dot_dimension_numbers<[1], [0], [0], [1], [0, 0, 1, 1], [], []>} : vector<8x128xf32>, vector<128x128xf32>, vector<8x128xf32> -> vector<8x128xf32>
      %63 = arith.addf %61, %62 : vector<8x128xf32>
      %64 = math.tanh %63 : vector<8x128xf32>
      %65 = arith.index_cast %59 : i32 to index
      %c0_41 = arith.constant 0 : index
      %66 = vector.load %arg9[%65, %c0_41] : memref<64x128xf32, #tpu.memory_space<vmem>>, vector<8x128xf32>
      tpu.vector_store %arg9[%65, %c0_41], %64 {strides = array<i32>} : memref<64x128xf32, #tpu.memory_space<vmem>>, vector<8x128xf32>,
      %c5_i32 = arith.constant 5 : i32
      %c8_i32_42 = arith.constant 8 : i32
      %67 = arith.muli %c5_i32, %c8_i32_42 : i32
      %68 = tpu.assume_multiple %67, 8 : i32
      %69 = arith.index_cast %68 : i32 to index
      %c0_43 = arith.constant 0 : index
      %70 = vector.load %arg9[%69, %c0_43] : memref<64x128xf32, #tpu.memory_space<vmem>>, vector<8x128xf32>
      %cst_44 = arith.constant dense<0.000000e+00> : vector<8x128xf32>
      %71 = tpu.matmul %64, %15, %cst_44 {dimension_numbers = #tpu.dot_dimension_numbers<[1], [0], [0], [1], [0, 0, 1, 1], [], []>} : vector<8x128xf32>, vector<128x128xf32>, vector<8x128xf32> -> vector<8x128xf32>
      %72 = arith.addf %70, %71 : vector<8x128xf32>
      %73 = math.tanh %72 : vector<8x128xf32>
      %74 = arith.index_cast %68 : i32 to index
      %c0_45 = arith.constant 0 : index
      %75 = vector.load %arg9[%74, %c0_45] : memref<64x128xf32, #tpu.memory_space<vmem>>, vector<8x128xf32>
      tpu.vector_store %arg9[%74, %c0_45], %73 {strides = array<i32>} : memref<64x128xf32, #tpu.memory_space<vmem>>, vector<8x128xf32>,
      %c6_i32 = arith.constant 6 : i32
      %c8_i32_46 = arith.constant 8 : i32
      %76 = arith.muli %c6_i32, %c8_i32_46 : i32
      %77 = tpu.assume_multiple %76, 8 : i32
      %78 = arith.index_cast %77 : i32 to index
      %c0_47 = arith.constant 0 : index
      %79 = vector.load %arg9[%78, %c0_47] : memref<64x128xf32, #tpu.memory_space<vmem>>, vector<8x128xf32>
      %cst_48 = arith.constant dense<0.000000e+00> : vector<8x128xf32>
      %80 = tpu.matmul %73, %15, %cst_48 {dimension_numbers = #tpu.dot_dimension_numbers<[1], [0], [0], [1], [0, 0, 1, 1], [], []>} : vector<8x128xf32>, vector<128x128xf32>, vector<8x128xf32> -> vector<8x128xf32>
      %81 = arith.addf %79, %80 : vector<8x128xf32>
      %82 = math.tanh %81 : vector<8x128xf32>
      %83 = arith.index_cast %77 : i32 to index
      %c0_49 = arith.constant 0 : index
      %84 = vector.load %arg9[%83, %c0_49] : memref<64x128xf32, #tpu.memory_space<vmem>>, vector<8x128xf32>
      tpu.vector_store %arg9[%83, %c0_49], %82 {strides = array<i32>} : memref<64x128xf32, #tpu.memory_space<vmem>>, vector<8x128xf32>,
      %c7_i32 = arith.constant 7 : i32
      %c8_i32_50 = arith.constant 8 : i32
      %85 = arith.muli %c7_i32, %c8_i32_50 : i32
      %86 = tpu.assume_multiple %85, 8 : i32
      %87 = arith.index_cast %86 : i32 to index
      %c0_51 = arith.constant 0 : index
      %88 = vector.load %arg9[%87, %c0_51] : memref<64x128xf32, #tpu.memory_space<vmem>>, vector<8x128xf32>
      %cst_52 = arith.constant dense<0.000000e+00> : vector<8x128xf32>
      %89 = tpu.matmul %82, %15, %cst_52 {dimension_numbers = #tpu.dot_dimension_numbers<[1], [0], [0], [1], [0, 0, 1, 1], [], []>} : vector<8x128xf32>, vector<128x128xf32>, vector<8x128xf32> -> vector<8x128xf32>
      %90 = arith.addf %88, %89 : vector<8x128xf32>
      %91 = math.tanh %90 : vector<8x128xf32>
      %92 = arith.index_cast %86 : i32 to index
      %c0_53 = arith.constant 0 : index
      %93 = vector.load %arg9[%92, %c0_53] : memref<64x128xf32, #tpu.memory_space<vmem>>, vector<8x128xf32>
      tpu.vector_store %arg9[%92, %c0_53], %91 {strides = array<i32>} : memref<64x128xf32, #tpu.memory_space<vmem>>, vector<8x128xf32>,
      %c8_i32_54 = arith.constant 8 : i32
    } else {
    }
    %c0 = arith.constant 0 : index
    %c0_1 = arith.constant 0 : index
    %3 = vector.load %arg9[%c0, %c0_1] : memref<64x128xf32, #tpu.memory_space<vmem>>, vector<64x128xf32>
    %c0_2 = arith.constant 0 : index
    %c0_3 = arith.constant 0 : index
    %4 = vector.load %arg6[%c0_2, %c0_3] : memref<128x128xf32, #tpu.memory_space<vmem>>, vector<128x128xf32>
    %cst = arith.constant dense<0.000000e+00> : vector<64x128xf32>
    %5 = tpu.matmul %3, %4, %cst {dimension_numbers = #tpu.dot_dimension_numbers<[1], [0], [0], [1], [0, 0, 1, 1], [], []>} : vector<64x128xf32>, vector<128x128xf32>, vector<64x128xf32> -> vector<64x128xf32>
    %c0_4 = arith.constant 0 : index
    %c0_5 = arith.constant 0 : index
    %6 = vector.load %arg7[%c0_4, %c0_5] : memref<1x128xf32, #tpu.memory_space<vmem>>, vector<1x128xf32>
    %7 = vector.broadcast %6 : vector<1x128xf32> to vector<64x128xf32>
    %8 = arith.addf %5, %7 : vector<64x128xf32>
    %c0_6 = arith.constant 0 : index
    %c0_7 = arith.constant 0 : index
    %c0_8 = arith.constant 0 : index
    %9 = vector.load %arg8[%c0_6, %c0_7, %c0_8] : memref<1x64x128xf32, #tpu.memory_space<vmem>>, vector<1x64x128xf32>
    %10 = vector.shape_cast %9 : vector<1x64x128xf32> to vector<64x128xf32>
    %11 = vector.shape_cast %8 : vector<64x128xf32> to vector<1x64x128xf32>
    tpu.vector_store %arg8[%c0_6, %c0_7, %c0_8], %11 {strides = array<i32>} : memref<1x64x128xf32, #tpu.memory_space<vmem>>, vector<1x64x128xf32>,
    return
  }
  func.func @transform_0(%arg0: i32, %arg1: i32) -> (i32, i32, i32) {
    %c0_i32 = arith.constant 0 : i32
    %c0_i32_0 = arith.constant 0 : i32
    %c0_i32_1 = arith.constant 0 : i32
    return %arg0, %c0_i32, %c0_i32_0 : i32, i32, i32
  }
  func.func @transform_1(%arg0: i32, %arg1: i32) -> (i32, i32) {
    %c0_i32 = arith.constant 0 : i32
    %c0_i32_0 = arith.constant 0 : i32
    %c0_i32_1 = arith.constant 0 : i32
    return %c0_i32, %c0_i32_0 : i32, i32
  }
  func.func @transform_2(%arg0: i32, %arg1: i32) -> (i32, i32) {
    %c0_i32 = arith.constant 0 : i32
    %c0_i32_0 = arith.constant 0 : i32
    %c0_i32_1 = arith.constant 0 : i32
    return %c0_i32, %c0_i32_0 : i32, i32
  }
  func.func @transform_3(%arg0: i32, %arg1: i32) -> (i32, i32) {
    %c0_i32 = arith.constant 0 : i32
    %c0_i32_0 = arith.constant 0 : i32
    %c0_i32_1 = arith.constant 0 : i32
    return %c0_i32, %c0_i32_0 : i32, i32
  }
  func.func @transform_4(%arg0: i32, %arg1: i32) -> (i32, i32) {
    %c0_i32 = arith.constant 0 : i32
    %c0_i32_0 = arith.constant 0 : i32
    return %c0_i32, %arg1 : i32, i32
  }
  func.func @transform_5(%arg0: i32, %arg1: i32) -> (i32, i32) {
    %c0_i32 = arith.constant 0 : i32
    %c0_i32_0 = arith.constant 0 : i32
    return %c0_i32, %arg1 : i32, i32
  }
  func.func @transform_6(%arg0: i32, %arg1: i32) -> (i32, i32, i32) {
    %c0_i32 = arith.constant 0 : i32
    %c0_i32_0 = arith.constant 0 : i32
    return %arg0, %c0_i32, %arg1 : i32, i32, i32
  }
}

</mosaic_0001>

<bundles_post_ra>
// kernel: tpu_custom_call.1
= control target key start
LH: loop header
LB: loop body
LE: loop exit
PB: predicated region body
PF: predicated region fallthrough
CT: control target
= control target key end

     0   :  { %11 = vsyncpa [#allocation4], 0  ;;  %s2122_s0 = inlined_call_operand.hbm [shape: f32[1,64,128], index: 0, kind: input, shape index: {}]   ;;  %s2123_s1 = inlined_call_operand.hbm [shape: f32[128,128], index: 1, kind: input, shape index: {}]   ;;  %s2124_s2 = inlined_call_operand.hbm [shape: f32[128,128], index: 2, kind: input, shape index: {}]   ;;  %s2125_s3 = inlined_call_operand.vmem [shape: f32[1,128], index: 3, kind: input, shape index: {}]   ;;  %s2126_s4 = inlined_call_operand.hbm [shape: f32[128,128], index: 4, kind: input, shape index: {}]   ;;  %s2127_s5 = inlined_call_operand.vmem [shape: f32[1,128], index: 5, kind: input, shape index: {}]   ;;  %s2128_s6 = inlined_call_operand.hbm [shape: f32[1,64,128], index: 6, kind: output, shape index: {}]  }
   0x1   :  { %12 = vsyncpa [#allocation7], 0 }
   0x2   :  { %13 = vsyncpa [#allocation10], 0 }
   0x3   :  { %14 = vsyncpa [#allocation5], 0  ;;  %s1692_s21 = smov [#allocation6]   ;;  %s1693_s23 = smov [#allocation3]  }
   0x4   :  { %s32_s22 = sshll.u32 %s1692_s21, 4  ;;  %s20_s24 = sshll.u32 %s1693_s23, 4  ;;  %s33_s22 = int_to_ptr.vmem [resolvable:$true] %s32_s22  ;;  %s21_s24 = int_to_ptr.vmem [resolvable:$true] %s20_s24 }
   0x5   :  { %s1592_s25 = scalar_lea.vmem %s33_s22, 2048  ;;  %p1597_p1 = scmp.lt.s32.totalorder %s33_s22, %s33_s22 }
   0x6   :  { %p1593_p0 = scmp.ne.s32.totalorder %s33_s22, %s1592_s25  ;;  %p1598_p2 = scmp.lt.s32.totalorder %s1592_s25, %s1592_s25 }
   0x8   :  { %p1599_p3 = por %p1598_p2, %p1597_p1 }
   0xa   :  { %p1600_p4 = pnand %p1599_p3, %p1593_p0 }
   0xc   :  { %1603 = shalt.err (!%p1600_p4)
}
   0xd   :  { %s1694_s26 = smov 128   ;;  %s1695_s27 = smov 8  }
   0xe   :  { %38 = dma.hbm_to_vmem [thread:$0]  %s2123_s1, 2048, %s33_s22, [#allocation7], %s1694_s26, %s1694_s26, %s1695_s27  }
   0xf   :  { %s1612_s30 = scalar_lea.vmem %s21_s24, 1024  ;;  %p1617_p6 = scmp.lt.s32.totalorder %s21_s24, %s21_s24 }
  0x10   :  { %p1613_p5 = scmp.ne.s32.totalorder %s21_s24, %s1612_s30  ;;  %p1618_p7 = scmp.lt.s32.totalorder %s1612_s30, %s1612_s30 }
  0x12   :  { %p1619_p8 = por %p1618_p7, %p1617_p6 }
  0x14   :  { %p1620_p9 = pnand %p1619_p8, %p1613_p5 }
  0x16   :  { %1623 = shalt.err (!%p1620_p9)
}
  0x17   :  { %26 = dma.hbm_to_vmem [thread:$0]  %s2122_s0, 1024, %s21_s24, [#allocation4], %s1694_s26, %s1694_s26, %s1695_s27  }
  0x18   :  { %s1696_s9 = smov [#allocation8]   ;;  %s1697_s11 = smov [#allocation9]  }
  0x19   :  { %s44_s10 = sshll.u32 %s1696_s9, 4  ;;  %s58_s12 = sshll.u32 %s1697_s11, 4  ;;  %s45_s10 = int_to_ptr.vmem [resolvable:$true] %s44_s10  ;;  %s59_s12 = int_to_ptr.vmem [resolvable:$true] %s58_s12 }
  0x1a   :  { %s1632_s1 = scalar_lea.vmem %s45_s10, 2048  ;;  %p1637_p11 = scmp.lt.s32.totalorder %s45_s10, %s45_s10 }
  0x1b   :  { %p1633_p10 = scmp.ne.s32.totalorder %s45_s10, %s1632_s1  ;;  %p1638_p12 = scmp.lt.s32.totalorder %s1632_s1, %s1632_s1 }
  0x1d   :  { %p1639_p13 = por %p1638_p12, %p1637_p11 }
  0x1f   :  { %p1640_p0 = pnand %p1639_p13, %p1633_p10 }
  0x21   :  { %1643 = shalt.err (!%p1640_p0)
}
  0x22   :  { %50 = dma.hbm_to_vmem [thread:$0]  %s2124_s2, 2048, %s45_s10, [#allocation7], %s1694_s26, %s1694_s26, %s1695_s27  }
  0x23   :  { %s1652_s0 = scalar_lea.vmem %s59_s12, 2048  ;;  %p1657_p2 = scmp.lt.s32.totalorder %s59_s12, %s59_s12 }
  0x24   :  { %p1653_p1 = scmp.ne.s32.totalorder %s59_s12, %s1652_s0  ;;  %p1658_p3 = scmp.lt.s32.totalorder %s1652_s0, %s1652_s0 }
  0x26   :  { %p1659_p4 = por %p1658_p3, %p1657_p2 }
  0x28   :  { %p1660_p5 = pnand %p1659_p4, %p1653_p1 }
  0x2a   :  { %1663 = shalt.err (!%p1660_p5)
}
  0x2b   :  { %64 = dma.hbm_to_vmem [thread:$0]  %s2126_s4, 2048, %s59_s12, [#allocation10], %s1694_s26, %s1694_s26, %s1695_s27  }
  0x2c   :  { %1684 = dma.done.wait [#allocation4], 1024  }
  0x2d   :  { %1685 = vsyncadd [#allocation4], 4294966272 }
  0x2e   :  { %1686 = dma.done.wait [#allocation7], 4096  }
  0x2f   :  { %1687 = vsyncadd [#allocation7], 4294963200 }
  0x30   :  { %1688 = dma.done.wait [#allocation10], 2048  }
  0x31   :  { %1689 = vsyncadd [#allocation10], 4294965248  ;;  %v1698_v0 = vmov 0.0   ;;  %vm1699_vm0 = vmmov 0   ;;  %v106_v1 = vld [vmem:[#allocation6 + $0x78] sm:$0xff]  ;;  %v105_v2 = vld [vmem:[#allocation6 + $0x70] sm:$0xff] }
  0x32   :  { %1235 = vmatprep.subr.mxu1 %v1698_v0  ;;  %1267 = vmatprep.mubr.msk.f32.mxu1 %vm1699_vm0, %v1698_v0  ;;  %v1763_v3 = vld [vmem:[#allocation8 + $0x78] sm:$0xff]  ;;  %v1766_v4 = vld [vmem:[#allocation8 + $0x70] sm:$0xff]  ;;  %v104_v5 = vld [vmem:[#allocation6 + $0x68] sm:$0xff] }
  0x33   :  { %1191 = vmatprep.subr.mxu0 %v106_v1  ;;  %1236 = vmatpush3.msra.mxu1 %v1763_v3  ;;  %v1769_v6 = vld [vmem:[#allocation8 + $0x68] sm:$0xff]  ;;  %v103_v7 = vld [vmem:[#allocation6 + $0x60] sm:$0xff]  ;;  %v102_v9 = vld [vmem:[#allocation6 + $0x58] sm:$0xff] }
  0x34   :  { %1192 = vmatpush3.msra.mxu0 %v106_v1  ;;  %1237 = vmatprep.subr.mxu1 %v1698_v0  ;;  %v1773_v8 = vld [vmem:[#allocation8 + $0x60] sm:$0xff]  ;;  %v1777_v10 = vld [vmem:[#allocation8 + $0x58] sm:$0xff]  ;;  %v101_v11 = vld [vmem:[#allocation6 + $0x50] sm:$0xff] }
  0x35   :  { %1193 = vmatprep.subr.mxu0 %v105_v2  ;;  %1238 = vmatpush3.msra.mxu1 %v1766_v4  ;;  %v1781_v12 = vld [vmem:[#allocation8 + $0x50] sm:$0xff]  ;;  %v100_v13 = vld [vmem:[#allocation6 + $0x48] sm:$0xff]  ;;  %v99_v15 = vld [vmem:[#allocation6 + $0x40] sm:$0xff] }
  0x36   :  { %1194 = vmatpush3.msra.mxu0 %v105_v2  ;;  %1239 = vmatprep.subr.mxu1 %v1698_v0  ;;  %v1785_v14 = vld [vmem:[#allocation8 + $0x48] sm:$0xff]  ;;  %v1789_v16 = vld [vmem:[#allocation8 + $0x40] sm:$0xff]  ;;  %v98_v17 = vld [vmem:[#allocation6 + $0x38] sm:$0xff] }
  0x37   :  { %1195 = vmatprep.subr.mxu0 %v104_v5  ;;  %1240 = vmatpush3.msra.mxu1 %v1769_v6  ;;  %v1793_v18 = vld [vmem:[#allocation8 + $0x38] sm:$0xff]  ;;  %v97_v19 = vld [vmem:[#allocation6 + $0x30] sm:$0xff]  ;;  %v96_v21 = vld [vmem:[#allocation6 + $0x28] sm:$0xff] }
  0x38   :  { %1196 = vmatpush3.msra.mxu0 %v104_v5  ;;  %1241 = vmatprep.subr.mxu1 %v1698_v0  ;;  %v1797_v20 = vld [vmem:[#allocation8 + $0x30] sm:$0xff]  ;;  %v1801_v22 = vld [vmem:[#allocation8 + $0x28] sm:$0xff]  ;;  %v95_v23 = vld [vmem:[#allocation6 + $0x20] sm:$0xff] }
  0x39   :  { %1197 = vmatprep.subr.mxu0 %v103_v7  ;;  %1242 = vmatpush3.msra.mxu1 %v1773_v8  ;;  %v1805_v24 = vld [vmem:[#allocation8 + $0x20] sm:$0xff]  ;;  %v94_v25 = vld [vmem:[#allocation6 + $0x18] sm:$0xff]  ;;  %v93_v27 = vld [vmem:[#allocation6 + $0x10] sm:$0xff] }
  0x3a   :  { %1198 = vmatpush3.msra.mxu0 %v103_v7  ;;  %1243 = vmatprep.subr.mxu1 %v1698_v0  ;;  %v1809_v26 = vld [vmem:[#allocation8 + $0x18] sm:$0xff]  ;;  %v1813_v28 = vld [vmem:[#allocation8 + $0x10] sm:$0xff]  ;;  %v92_v29 = vld [vmem:[#allocation6 + $0x8] sm:$0xff] }
  0x3b   :  { %1199 = vmatprep.subr.mxu0 %v102_v9  ;;  %1244 = vmatpush3.msra.mxu1 %v1777_v10  ;;  %v83_v30 = vld [vmem:[#allocation3] sm:$0xff]  ;;  %v1818_v31 = vld [vmem:[#allocation8 + $0x8] sm:$0xff]  ;;  %v85_v35 = vld [vmem:[#allocation3 + $0x10] sm:$0xff] }
  0x3c   :  { %1200 = vmatpush3.msra.mxu0 %v102_v9  ;;  %1245 = vmatprep.subr.mxu1 %v1698_v0  ;;  %v91_v32 = vld [vmem:[#allocation6] sm:$0xff]  ;;  %v84_v34 = vld [vmem:[#allocation3 + $0x8] sm:$0xff]  ;;  %v86_v36 = vld [vmem:[#allocation3 + $0x18] sm:$0xff] }
  0x3d   :  { %1201 = vmatprep.subr.mxu0 %v101_v11  ;;  %1246 = vmatpush3.msra.mxu1 %v1781_v12  ;;  %v1821_v33 = vld [vmem:[#allocation8] sm:$0xff]  ;;  %v88_v38 = vld [vmem:[#allocation3 + $0x28] sm:$0xff]  ;;  %v89_v39 = vld [vmem:[#allocation3 + $0x30] sm:$0xff] }
  0x3e   :  { %1202 = vmatpush3.msra.mxu0 %v101_v11  ;;  %1247 = vmatprep.subr.mxu1 %v1698_v0  ;;  %v87_v37 = vld [vmem:[#allocation3 + $0x20] sm:$0xff]  ;;  %v90_v40 = vld [vmem:[#allocation3 + $0x38] sm:$0xff] }
  0x3f   :  { %1203 = vmatprep.subr.mxu0 %v100_v13  ;;  %1248 = vmatpush3.msra.mxu1 %v1785_v14  ;;  %v1900_v43 = vld [vmem:[%s2125_s3] ss:$0 sm:$0xff] }
  0x40   :  { %1204 = vmatpush3.msra.mxu0 %v100_v13  ;;  %1249 = vmatprep.subr.mxu1 %v1698_v0 }
  0x41   :  { %1205 = vmatprep.subr.mxu0 %v99_v15  ;;  %1250 = vmatpush3.msra.mxu1 %v1789_v16 }
  0x42   :  { %1206 = vmatpush3.msra.mxu0 %v99_v15  ;;  %1251 = vmatprep.subr.mxu1 %v1698_v0 }
  0x43   :  { %1207 = vmatprep.subr.mxu0 %v98_v17  ;;  %1252 = vmatpush3.msra.mxu1 %v1793_v18 }
  0x44   :  { %1208 = vmatpush3.msra.mxu0 %v98_v17  ;;  %1253 = vmatprep.subr.mxu1 %v1698_v0 }
  0x45   :  { %1209 = vmatprep.subr.mxu0 %v97_v19  ;;  %1254 = vmatpush3.msra.mxu1 %v1797_v20 }
  0x46   :  { %1210 = vmatpush3.msra.mxu0 %v97_v19  ;;  %1255 = vmatprep.subr.mxu1 %v1698_v0 }
  0x47   :  { %1211 = vmatprep.subr.mxu0 %v96_v21  ;;  %1256 = vmatpush3.msra.mxu1 %v1801_v22 }
  0x48   :  { %1212 = vmatpush3.msra.mxu0 %v96_v21  ;;  %1257 = vmatprep.subr.mxu1 %v1698_v0 }
  0x49   :  { %1213 = vmatprep.subr.mxu0 %v95_v23  ;;  %1258 = vmatpush3.msra.mxu1 %v1805_v24 }
  0x4a   :  { %1214 = vmatpush3.msra.mxu0 %v95_v23  ;;  %1259 = vmatprep.subr.mxu1 %v1698_v0  ;;  %v858_v23 = vld [vmem:[#allocation9 + $0x40] sm:$0xff] }
  0x4b   :  { %1215 = vmatprep.subr.mxu0 %v94_v25  ;;  %1260 = vmatpush3.msra.mxu1 %v1809_v26 }
  0x4c   :  { %1216 = vmatpush3.msra.mxu0 %v94_v25  ;;  %1261 = vmatprep.subr.mxu1 %v1698_v0  ;;  %v856_v25 = vld [vmem:[#allocation9 + $0x30] sm:$0xff] }
  0x4d   :  { %1217 = vmatprep.subr.mxu0 %v93_v27  ;;  %1262 = vmatpush3.msra.mxu1 %v1813_v28 }
  0x4e   :  { %1218 = vmatpush3.msra.mxu0 %v93_v27  ;;  %1263 = vmatprep.subr.mxu1 %v1698_v0  ;;  %v854_v27 = vld [vmem:[#allocation9 + $0x20] sm:$0xff] }
  0x4f   :  { %1219 = vmatprep.subr.mxu0 %v92_v29  ;;  %1223 = vmatprep.mubr.f32.mxu0 %v83_v30  ;;  %v851_v30 = vld [vmem:[#allocation9 + $0x8] sm:$0xff] }
  0x50   :  { %1220 = vmatpush3.msra.mxu0 %v92_v29  ;;  %1264 = vmatpush3.msra.mxu1 %v1818_v31  ;;  %v852_v29 = vld [vmem:[#allocation9 + $0x10] sm:$0xff] }
  0x51   :  { %1221 = vmatprep.subr.mxu0 %v91_v32  ;;  %1265 = vmatprep.subr.mxu1 %v1698_v0 }
  0x52   :  { %1222 = vmatpush3.msra.mxu0 %v91_v32  ;;  %1266 = vmatpush3.msra.mxu1 %v1821_v33 }
  0x53   :  { %1224 = vmatmul.mubr.f32.vlgmr.msra.gmra.mxu0 %v84_v34  ;;  %1268 = vmatmul.mubr.f32.vlgmr.msra.gmra.mxu1 %v1698_v0 }
  0x54   :  { %1270 = vmatprep.subr.mxu0 %v1698_v0  ;;  %1305 = vmatprep.subr.mxu1 %v1698_v0 }
  0x55   :  { %1271 = vmatpush3.msra.mxu0 %v1763_v3  ;;  %1306 = vmatpush3.msra.mxu1 %v1763_v3 }
  0x56   :  { %1272 = vmatprep.subr.mxu0 %v1698_v0  ;;  %1307 = vmatprep.subr.mxu1 %v1698_v0 }
  0x57   :  { %1273 = vmatpush3.msra.mxu0 %v1766_v4  ;;  %1308 = vmatpush3.msra.mxu1 %v1766_v4 }
  0x58   :  { %1274 = vmatprep.subr.mxu0 %v1698_v0  ;;  %1309 = vmatprep.subr.mxu1 %v1698_v0 }
  0x59   :  { %1275 = vmatpush3.msra.mxu0 %v1769_v6  ;;  %1310 = vmatpush3.msra.mxu1 %v1769_v6 }
  0x5a   :  { %1276 = vmatprep.subr.mxu0 %v1698_v0  ;;  %1311 = vmatprep.subr.mxu1 %v1698_v0 }
  0x5b   :  { %1277 = vmatpush3.msra.mxu0 %v1773_v8  ;;  %1312 = vmatpush3.msra.mxu1 %v1773_v8 }
  0x5c   :  { %1278 = vmatprep.subr.mxu0 %v1698_v0  ;;  %1313 = vmatprep.subr.mxu1 %v1698_v0 }
  0x5d   :  { %1279 = vmatpush3.msra.mxu0 %v1777_v10  ;;  %1314 = vmatpush3.msra.mxu1 %v1777_v10 }
  0x5e   :  { %1280 = vmatprep.subr.mxu0 %v1698_v0  ;;  %1315 = vmatprep.subr.mxu1 %v1698_v0 }
  0x5f   :  { %1281 = vmatpush3.msra.mxu0 %v1781_v12  ;;  %1316 = vmatpush3.msra.mxu1 %v1781_v12 }
  0x60   :  { %1282 = vmatprep.subr.mxu0 %v1698_v0  ;;  %1317 = vmatprep.subr.mxu1 %v1698_v0 }
  0x61   :  { %1283 = vmatpush3.msra.mxu0 %v1785_v14  ;;  %1318 = vmatpush3.msra.mxu1 %v1785_v14 }
  0x62   :  { %1284 = vmatprep.subr.mxu0 %v1698_v0  ;;  %1319 = vmatprep.subr.mxu1 %v1698_v0 }
  0x63   :  { %1285 = vmatpush3.msra.mxu0 %v1789_v16  ;;  %1320 = vmatpush3.msra.mxu1 %v1789_v16 }
  0x64   :  { %1286 = vmatprep.subr.mxu0 %v1698_v0  ;;  %1321 = vmatprep.subr.mxu1 %v1698_v0 }
  0x65   :  { %1287 = vmatpush3.msra.mxu0 %v1793_v18  ;;  %1322 = vmatpush3.msra.mxu1 %v1793_v18 }
  0x66   :  { %1288 = vmatprep.subr.mxu0 %v1698_v0  ;;  %1323 = vmatprep.subr.mxu1 %v1698_v0 }
  0x67   :  { %1289 = vmatpush3.msra.mxu0 %v1797_v20  ;;  %1324 = vmatpush3.msra.mxu1 %v1797_v20 }
  0x68   :  { %1290 = vmatprep.subr.mxu0 %v1698_v0  ;;  %1325 = vmatprep.subr.mxu1 %v1698_v0 }
  0x69   :  { %1291 = vmatpush3.msra.mxu0 %v1801_v22  ;;  %1326 = vmatpush3.msra.mxu1 %v1801_v22 }
  0x6a   :  { %1292 = vmatprep.subr.mxu0 %v1698_v0  ;;  %1327 = vmatprep.subr.mxu1 %v1698_v0 }
  0x6b   :  { %1293 = vmatpush3.msra.mxu0 %v1805_v24  ;;  %1328 = vmatpush3.msra.mxu1 %v1805_v24 }
  0x6c   :  { %1294 = vmatprep.subr.mxu0 %v1698_v0  ;;  %1329 = vmatprep.subr.mxu1 %v1698_v0 }
  0x6d   :  { %1295 = vmatpush3.msra.mxu0 %v1809_v26  ;;  %1330 = vmatpush3.msra.mxu1 %v1809_v26 }
  0x6e   :  { %1296 = vmatprep.subr.mxu0 %v1698_v0  ;;  %1331 = vmatprep.subr.mxu1 %v1698_v0 }
  0x6f   :  { %1297 = vmatpush3.msra.mxu0 %v1813_v28  ;;  %1332 = vmatpush3.msra.mxu1 %v1813_v28 }
  0x70   :  { %1298 = vmatprep.subr.mxu0 %v1698_v0  ;;  %1333 = vmatprep.subr.mxu1 %v1698_v0 }
  0x71   :  { %1299 = vmatpush3.msra.mxu0 %v1818_v31  ;;  %1334 = vmatpush3.msra.mxu1 %v1818_v31 }
  0x72   :  { %1300 = vmatprep.subr.mxu0 %v1698_v0  ;;  %1335 = vmatprep.subr.mxu1 %v1698_v0 }
  0x73   :  { %1301 = vmatpush3.msra.mxu0 %v1821_v33  ;;  %1336 = vmatpush3.msra.mxu1 %v1821_v33 }
  0x74   :  { %1337 = vmatprep.mubr.msk.f32.mxu1 %vm1699_vm0, %v1698_v0  ;;  %1340 = vmatprep.subr.mxu0 %v1698_v0 }
  0x75   :  { %1375 = vmatprep.subr.mxu1 %v1698_v0  ;;  %1226 = vmatprep.mubr.f32.mxu0 %v85_v35 }
  0x76   :  { %1227 = vmatmul.mubr.f32.gmra.mxu0 %v86_v36 }
  0x77   :  { %1229 = vmatprep.mubr.f32.mxu0 %v87_v37  ;;  %v1006_v37 = vld [vmem:[%s2127_s5] ss:$0 sm:$0xff]  ;;  %s1700_s5 = smov [#allocation11]  }
  0x78   :  { %s991_s18 = sshll.u32 %s1700_s5, 4  ;;  %s992_s18 = int_to_ptr.vmem [resolvable:$true] %s991_s18 }
  0x79   :  { %s1664_s19 = scalar_lea.vmem %s992_s18, 1024  ;;  %p1669_p7 = scmp.lt.s32.totalorder %s992_s18, %s992_s18 }
  0x7a   :  { %1230 = vmatmul.mubr.f32.gmra.mxu0 %v88_v38  ;;  %p1665_p6 = scmp.ne.s32.totalorder %s992_s18, %s1664_s19  ;;  %p1670_p8 = scmp.lt.s32.totalorder %s1664_s19, %s1664_s19 }
  0x7b   :  { %1232 = vmatprep.mubr.f32.mxu0 %v89_v39 }
  0x7c   :  { %p1671_p9 = por %p1670_p8, %p1669_p7 }
  0x7e   :  { %1233 = vmatmul.mubr.f32.gmra.mxu0 %v90_v40  ;;  %p1672_p10 = pnand %p1671_p9, %p1665_p6 }
  0x7f   :  { %1302 = vmatprep.mubr.msk.f32.mxu0 %vm1699_vm0, %v1698_v0 }
 0x113   :  { %v1225_v41 = vpop.f32.mrf.mxu0  ;;  %v310_v42 = vpop.f32.mrf.mxu1 }
 0x114   :  { %v202_v55 = vadd.f32 %v1225_v41, %v1900_v43 }
 0x115   :  { %v196_v44 = vpop.f32.mrf.mxu0  ;;  %v1269_v45 = vpop.f32.mrf.mxu1 }
 0x116   :  { %v197_v46 = vadd.f32 %v1900_v43, %v196_v44 }
 0x118   :  { %v314_v47 = vadd.f32 %v310_v42, %v197_v46 }
 0x11a   :  { %1568 = vtanh.f32 %v314_v47 }
 0x127   :  { %v1903_v48 = vpop.eup %1568 }
 0x128   :  { %1303 = vmatmul.mubr.f32.vlgmr.msra.gmra.mxu0 %v1903_v48 }
 0x129   :  { %1341 = vmatpush3.msra.mxu0 %v1763_v3  ;;  %1372 = vmatprep.mubr.msk.f32.mxu0 %vm1699_vm0, %v1698_v0 }
 0x12a   :  { %1342 = vmatprep.subr.mxu0 %v1698_v0 }
 0x12b   :  { %1343 = vmatpush3.msra.mxu0 %v1766_v4 }
 0x12c   :  { %1344 = vmatprep.subr.mxu0 %v1698_v0 }
 0x12d   :  { %1345 = vmatpush3.msra.mxu0 %v1769_v6 }
 0x12e   :  { %1346 = vmatprep.subr.mxu0 %v1698_v0 }
 0x12f   :  { %1347 = vmatpush3.msra.mxu0 %v1773_v8 }
 0x130   :  { %1348 = vmatprep.subr.mxu0 %v1698_v0 }
 0x131   :  { %1349 = vmatpush3.msra.mxu0 %v1777_v10 }
 0x132   :  { %1350 = vmatprep.subr.mxu0 %v1698_v0 }
 0x133   :  { %1351 = vmatpush3.msra.mxu0 %v1781_v12 }
 0x134   :  { %1352 = vmatprep.subr.mxu0 %v1698_v0 }
 0x135   :  { %1353 = vmatpush3.msra.mxu0 %v1785_v14 }
 0x136   :  { %1354 = vmatprep.subr.mxu0 %v1698_v0  ;;  %v1940_v49 = vpop.f32.mrf.mxu0 }
 0x137   :  { %1355 = vmatpush3.msra.mxu0 %v1789_v16  ;;  %v212_v2 = vadd.f32 %v1940_v49, %v1900_v43 }
 0x138   :  { %1356 = vmatprep.subr.mxu0 %v1698_v0  ;;  %v206_v50 = vpop.f32.mrf.mxu0 }
 0x139   :  { %1357 = vmatpush3.msra.mxu0 %v1793_v18  ;;  %v207_v60 = vadd.f32 %v1900_v43, %v206_v50 }
 0x13a   :  { %1358 = vmatprep.subr.mxu0 %v1698_v0  ;;  %v1942_v51 = vpop.f32.mrf.mxu0 }
 0x13b   :  { %1359 = vmatpush3.msra.mxu0 %v1797_v20 }
 0x13c   :  { %1360 = vmatprep.subr.mxu0 %v1698_v0  ;;  %v1944_v52 = vpop.f32.mrf.mxu0 }
 0x13d   :  { %1361 = vmatpush3.msra.mxu0 %v1801_v22  ;;  %v217_v13 = vadd.f32 %v1900_v43, %v1944_v52 }
 0x13e   :  { %1362 = vmatprep.subr.mxu0 %v1698_v0  ;;  %v1946_v53 = vpop.f32.mrf.mxu0 }
 0x13f   :  { %1363 = vmatpush3.msra.mxu0 %v1805_v24 }
 0x140   :  { %1364 = vmatprep.subr.mxu0 %v1698_v0  ;;  %v1948_v54 = vpop.f32.mrf.mxu0 }
 0x141   :  { %1365 = vmatpush3.msra.mxu0 %v1809_v26  ;;  %v227_v32 = vadd.f32 %v1900_v43, %v1948_v54 }
 0x142   :  { %1366 = vmatprep.subr.mxu0 %v1698_v0 }
 0x143   :  { %1367 = vmatpush3.msra.mxu0 %v1813_v28 }
 0x144   :  { %1368 = vmatprep.subr.mxu0 %v1698_v0 }
 0x145   :  { %1369 = vmatpush3.msra.mxu0 %v1818_v31 }
 0x146   :  { %1370 = vmatprep.subr.mxu0 %v1698_v0 }
 0x147   :  { %1371 = vmatpush3.msra.mxu0 %v1821_v33 }
 0x148   :  { %1410 = vmatprep.subr.mxu0 %v1698_v0 }
 0x1e8   :  { %v385_v56 = vpop.f32.mrf.mxu0 }
 0x1e9   :  { %v389_v57 = vadd.f32 %v385_v56, %v202_v55 }
 0x1ea   :  { %v1304_v58 = vpop.f32.mrf.mxu0 }
 0x1eb   :  { %1570 = vtanh.f32 %v389_v57 }
 0x1f8   :  { %v1951_v59 = vpop.eup %1570 }
 0x1f9   :  { %1338 = vmatmul.mubr.f32.vlgmr.msra.gmra.mxu1 %v1951_v59 }
 0x1fa   :  { %1376 = vmatpush3.msra.mxu1 %v1763_v3  ;;  %1407 = vmatprep.mubr.msk.f32.mxu1 %vm1699_vm0, %v1698_v0 }
 0x1fb   :  { %1377 = vmatprep.subr.mxu1 %v1698_v0 }
 0x1fc   :  { %1378 = vmatpush3.msra.mxu1 %v1766_v4 }
 0x1fd   :  { %1379 = vmatprep.subr.mxu1 %v1698_v0 }
 0x1fe   :  { %1380 = vmatpush3.msra.mxu1 %v1769_v6 }
 0x1ff   :  { %1381 = vmatprep.subr.mxu1 %v1698_v0 }
 0x200   :  { %1382 = vmatpush3.msra.mxu1 %v1773_v8 }
 0x201   :  { %1383 = vmatprep.subr.mxu1 %v1698_v0 }
 0x202   :  { %1384 = vmatpush3.msra.mxu1 %v1777_v10 }
 0x203   :  { %1385 = vmatprep.subr.mxu1 %v1698_v0 }
 0x204   :  { %1386 = vmatpush3.msra.mxu1 %v1781_v12 }
 0x205   :  { %1387 = vmatprep.subr.mxu1 %v1698_v0 }
 0x206   :  { %1388 = vmatpush3.msra.mxu1 %v1785_v14 }
 0x207   :  { %1389 = vmatprep.subr.mxu1 %v1698_v0 }
 0x208   :  { %1390 = vmatpush3.msra.mxu1 %v1789_v16 }
 0x209   :  { %1391 = vmatprep.subr.mxu1 %v1698_v0 }
 0x20a   :  { %1392 = vmatpush3.msra.mxu1 %v1793_v18 }
 0x20b   :  { %1393 = vmatprep.subr.mxu1 %v1698_v0 }
 0x20c   :  { %1394 = vmatpush3.msra.mxu1 %v1797_v20 }
 0x20d   :  { %1395 = vmatprep.subr.mxu1 %v1698_v0 }
 0x20e   :  { %1396 = vmatpush3.msra.mxu1 %v1801_v22 }
 0x20f   :  { %1397 = vmatprep.subr.mxu1 %v1698_v0 }
 0x210   :  { %1398 = vmatpush3.msra.mxu1 %v1805_v24 }
 0x211   :  { %1399 = vmatprep.subr.mxu1 %v1698_v0 }
 0x212   :  { %1400 = vmatpush3.msra.mxu1 %v1809_v26 }
 0x213   :  { %1401 = vmatprep.subr.mxu1 %v1698_v0 }
 0x214   :  { %1402 = vmatpush3.msra.mxu1 %v1813_v28 }
 0x215   :  { %1403 = vmatprep.subr.mxu1 %v1698_v0 }
 0x216   :  { %1404 = vmatpush3.msra.mxu1 %v1818_v31 }
 0x217   :  { %1405 = vmatprep.subr.mxu1 %v1698_v0 }
 0x218   :  { %1406 = vmatpush3.msra.mxu1 %v1821_v33 }
 0x219   :  { %1445 = vmatprep.subr.mxu1 %v1698_v0 }
 0x2b9   :  { %v460_v61 = vpop.f32.mrf.mxu1 }
 0x2ba   :  { %v464_v62 = vadd.f32 %v460_v61, %v207_v60 }
 0x2bb   :  { %v1339_v63 = vpop.f32.mrf.mxu1 }
 0x2bc   :  { %1572 = vtanh.f32 %v464_v62 }
 0x2c9   :  { %v1989_v1 = vpop.eup %1572 }
 0x2ca   :  { %1373 = vmatmul.mubr.f32.vlgmr.msra.gmra.mxu0 %v1989_v1 }
 0x2cb   :  { %1411 = vmatpush3.msra.mxu0 %v1763_v3  ;;  %1442 = vmatprep.mubr.msk.f32.mxu0 %vm1699_vm0, %v1698_v0 }
 0x2cc   :  { %1412 = vmatprep.subr.mxu0 %v1698_v0 }
 0x2cd   :  { %1413 = vmatpush3.msra.mxu0 %v1766_v4 }
 0x2ce   :  { %1414 = vmatprep.subr.mxu0 %v1698_v0 }
 0x2cf   :  { %1415 = vmatpush3.msra.mxu0 %v1769_v6 }
 0x2d0   :  { %1416 = vmatprep.subr.mxu0 %v1698_v0 }
 0x2d1   :  { %1417 = vmatpush3.msra.mxu0 %v1773_v8 }
 0x2d2   :  { %1418 = vmatprep.subr.mxu0 %v1698_v0 }
 0x2d3   :  { %1419 = vmatpush3.msra.mxu0 %v1777_v10 }
 0x2d4   :  { %1420 = vmatprep.subr.mxu0 %v1698_v0 }
 0x2d5   :  { %1421 = vmatpush3.msra.mxu0 %v1781_v12 }
 0x2d6   :  { %1422 = vmatprep.subr.mxu0 %v1698_v0 }
 0x2d7   :  { %1423 = vmatpush3.msra.mxu0 %v1785_v14 }
 0x2d8   :  { %1424 = vmatprep.subr.mxu0 %v1698_v0 }
 0x2d9   :  { %1425 = vmatpush3.msra.mxu0 %v1789_v16 }
 0x2da   :  { %1426 = vmatprep.subr.mxu0 %v1698_v0 }
 0x2db   :  { %1427 = vmatpush3.msra.mxu0 %v1793_v18 }
 0x2dc   :  { %1428 = vmatprep.subr.mxu0 %v1698_v0 }
 0x2dd   :  { %1429 = vmatpush3.msra.mxu0 %v1797_v20 }
 0x2de   :  { %1430 = vmatprep.subr.mxu0 %v1698_v0 }
 0x2df   :  { %1431 = vmatpush3.msra.mxu0 %v1801_v22 }
 0x2e0   :  { %1432 = vmatprep.subr.mxu0 %v1698_v0 }
 0x2e1   :  { %1433 = vmatpush3.msra.mxu0 %v1805_v24 }
 0x2e2   :  { %1434 = vmatprep.subr.mxu0 %v1698_v0 }
 0x2e3   :  { %1435 = vmatpush3.msra.mxu0 %v1809_v26 }
 0x2e4   :  { %1436 = vmatprep.subr.mxu0 %v1698_v0 }
 0x2e5   :  { %1437 = vmatpush3.msra.mxu0 %v1813_v28 }
 0x2e6   :  { %1438 = vmatprep.subr.mxu0 %v1698_v0 }
 0x2e7   :  { %1439 = vmatpush3.msra.mxu0 %v1818_v31 }
 0x2e8   :  { %1440 = vmatprep.subr.mxu0 %v1698_v0 }
 0x2e9   :  { %1441 = vmatpush3.msra.mxu0 %v1821_v33 }
 0x2ea   :  { %1480 = vmatprep.subr.mxu0 %v1698_v0 }
 0x38a   :  { %v535_v5 = vpop.f32.mrf.mxu0 }
 0x38b   :  { %v539_v7 = vadd.f32 %v535_v5, %v212_v2 }
 0x38c   :  { %v1374_v9 = vpop.f32.mrf.mxu0 }
 0x38d   :  { %1574 = vtanh.f32 %v539_v7 }
 0x39a   :  { %v2028_v11 = vpop.eup %1574 }
 0x39b   :  { %1408 = vmatmul.mubr.f32.vlgmr.msra.gmra.mxu1 %v2028_v11 }
 0x39c   :  { %1446 = vmatpush3.msra.mxu1 %v1763_v3  ;;  %1477 = vmatprep.mubr.msk.f32.mxu1 %vm1699_vm0, %v1698_v0 }
 0x39d   :  { %1447 = vmatprep.subr.mxu1 %v1698_v0 }
 0x39e   :  { %1448 = vmatpush3.msra.mxu1 %v1766_v4 }
 0x39f   :  { %1449 = vmatprep.subr.mxu1 %v1698_v0 }
 0x3a0   :  { %1450 = vmatpush3.msra.mxu1 %v1769_v6 }
 0x3a1   :  { %1451 = vmatprep.subr.mxu1 %v1698_v0 }
 0x3a2   :  { %1452 = vmatpush3.msra.mxu1 %v1773_v8 }
 0x3a3   :  { %1453 = vmatprep.subr.mxu1 %v1698_v0 }
 0x3a4   :  { %1454 = vmatpush3.msra.mxu1 %v1777_v10 }
 0x3a5   :  { %1455 = vmatprep.subr.mxu1 %v1698_v0 }
 0x3a6   :  { %1456 = vmatpush3.msra.mxu1 %v1781_v12 }
 0x3a7   :  { %1457 = vmatprep.subr.mxu1 %v1698_v0 }
 0x3a8   :  { %1458 = vmatpush3.msra.mxu1 %v1785_v14 }
 0x3a9   :  { %1459 = vmatprep.subr.mxu1 %v1698_v0 }
 0x3aa   :  { %1460 = vmatpush3.msra.mxu1 %v1789_v16 }
 0x3ab   :  { %1461 = vmatprep.subr.mxu1 %v1698_v0 }
 0x3ac   :  { %1462 = vmatpush3.msra.mxu1 %v1793_v18 }
 0x3ad   :  { %1463 = vmatprep.subr.mxu1 %v1698_v0 }
 0x3ae   :  { %1464 = vmatpush3.msra.mxu1 %v1797_v20 }
 0x3af   :  { %1465 = vmatprep.subr.mxu1 %v1698_v0 }
 0x3b0   :  { %1466 = vmatpush3.msra.mxu1 %v1801_v22 }
 0x3b1   :  { %1467 = vmatprep.subr.mxu1 %v1698_v0 }
 0x3b2   :  { %1468 = vmatpush3.msra.mxu1 %v1805_v24 }
 0x3b3   :  { %1469 = vmatprep.subr.mxu1 %v1698_v0 }
 0x3b4   :  { %1470 = vmatpush3.msra.mxu1 %v1809_v26 }
 0x3b5   :  { %1471 = vmatprep.subr.mxu1 %v1698_v0 }
 0x3b6   :  { %1472 = vmatpush3.msra.mxu1 %v1813_v28 }
 0x3b7   :  { %1473 = vmatprep.subr.mxu1 %v1698_v0 }
 0x3b8   :  { %1474 = vmatpush3.msra.mxu1 %v1818_v31 }
 0x3b9   :  { %1475 = vmatprep.subr.mxu1 %v1698_v0 }
 0x3ba   :  { %1476 = vmatpush3.msra.mxu1 %v1821_v33 }
 0x45b   :  { %v610_v15 = vpop.f32.mrf.mxu1 }
 0x45c   :  { %v614_v17 = vadd.f32 %v610_v15, %v217_v13 }
 0x45d   :  { %v1409_v19 = vpop.f32.mrf.mxu1 }
 0x45e   :  { %1576 = vtanh.f32 %v614_v17 }
 0x46b   :  { %v2066_v21 = vpop.eup %1576 }
 0x46c   :  { %1443 = vmatmul.mubr.f32.vlgmr.msra.gmra.mxu0 %v2066_v21 }
 0x46d   :  { %1481 = vmatpush3.msra.mxu0 %v1763_v3  ;;  %1512 = vmatprep.mubr.msk.f32.mxu0 %vm1699_vm0, %v1698_v0  ;;  %v865_v3 = vld [vmem:[#allocation9 + $0x78] sm:$0xff] }
 0x46e   :  { %1482 = vmatprep.subr.mxu0 %v1698_v0  ;;  %1515 = vmatprep.subr.mxu1 %v865_v3 }
 0x46f   :  { %1483 = vmatpush3.msra.mxu0 %v1766_v4  ;;  %v222_v4 = vadd.f32 %v1942_v51, %v1900_v43  ;;  %v232_v51 = vadd.f32 %v1946_v53, %v1900_v43 }
 0x470   :  { %1484 = vmatprep.subr.mxu0 %v1698_v0 }
 0x471   :  { %1485 = vmatpush3.msra.mxu0 %v1769_v6 }
 0x472   :  { %1486 = vmatprep.subr.mxu0 %v1698_v0 }
 0x473   :  { %1487 = vmatpush3.msra.mxu0 %v1773_v8 }
 0x474   :  { %1488 = vmatprep.subr.mxu0 %v1698_v0 }
 0x475   :  { %1489 = vmatpush3.msra.mxu0 %v1777_v10 }
 0x476   :  { %1490 = vmatprep.subr.mxu0 %v1698_v0 }
 0x477   :  { %1491 = vmatpush3.msra.mxu0 %v1781_v12 }
 0x478   :  { %1492 = vmatprep.subr.mxu0 %v1698_v0 }
 0x479   :  { %1493 = vmatpush3.msra.mxu0 %v1785_v14  ;;  %v864_v14 = vld [vmem:[#allocation9 + $0x70] sm:$0xff] }
 0x47a   :  { %1494 = vmatprep.subr.mxu0 %v1698_v0 }
 0x47b   :  { %1495 = vmatpush3.msra.mxu0 %v1789_v16  ;;  %v863_v16 = vld [vmem:[#allocation9 + $0x68] sm:$0xff] }
 0x47c   :  { %1496 = vmatprep.subr.mxu0 %v1698_v0 }
 0x47d   :  { %1497 = vmatpush3.msra.mxu0 %v1793_v18  ;;  %v861_v18 = vld [vmem:[#allocation9 + $0x58] sm:$0xff] }
 0x47e   :  { %1498 = vmatprep.subr.mxu0 %v1698_v0 }
 0x47f   :  { %1499 = vmatpush3.msra.mxu0 %v1797_v20  ;;  %v860_v20 = vld [vmem:[#allocation9 + $0x50] sm:$0xff] }
 0x480   :  { %1500 = vmatprep.subr.mxu0 %v1698_v0 }
 0x481   :  { %1501 = vmatpush3.msra.mxu0 %v1801_v22  ;;  %v859_v22 = vld [vmem:[#allocation9 + $0x48] sm:$0xff] }
 0x482   :  { %1502 = vmatprep.subr.mxu0 %v1698_v0 }
 0x483   :  { %1503 = vmatpush3.msra.mxu0 %v1805_v24  ;;  %v857_v24 = vld [vmem:[#allocation9 + $0x38] sm:$0xff] }
 0x484   :  { %1504 = vmatprep.subr.mxu0 %v1698_v0 }
 0x485   :  { %1505 = vmatpush3.msra.mxu0 %v1809_v26  ;;  %v855_v26 = vld [vmem:[#allocation9 + $0x28] sm:$0xff] }
 0x486   :  { %1506 = vmatprep.subr.mxu0 %v1698_v0 }
 0x487   :  { %1507 = vmatpush3.msra.mxu0 %v1813_v28  ;;  %v853_v28 = vld [vmem:[#allocation9 + $0x18] sm:$0xff] }
 0x488   :  { %1508 = vmatprep.subr.mxu0 %v1698_v0 }
 0x489   :  { %1509 = vmatpush3.msra.mxu0 %v1818_v31  ;;  %v850_v31 = vld [vmem:[#allocation9] sm:$0xff] }
 0x48a   :  { %1510 = vmatprep.subr.mxu0 %v1698_v0  ;;  %v862_v0 = vld [vmem:[#allocation9 + $0x60] sm:$0xff] }
 0x48b   :  { %1511 = vmatpush3.msra.mxu0 %v1821_v33 }
 0x52c   :  { %v685_v6 = vpop.f32.mrf.mxu0 }
 0x52d   :  { %v689_v8 = vadd.f32 %v685_v6, %v222_v4 }
 0x52e   :  { %v1444_v10 = vpop.f32.mrf.mxu0 }
 0x52f   :  { %1578 = vtanh.f32 %v689_v8 }
 0x53c   :  { %v1579_v12 = vpop.eup %1578 }
 0x53d   :  { %1478 = vmatmul.mubr.f32.vlgmr.msra.gmra.mxu1 %v1579_v12 }
 0x53e   :  { %1516 = vmatpush3.msra.mxu1 %v865_v3  ;;  %1547 = vmatprep.mubr.f32.mxu1 %v1903_v48 }
 0x53f   :  { %1517 = vmatprep.subr.mxu1 %v864_v14 }
 0x540   :  { %1518 = vmatpush3.msra.mxu1 %v864_v14 }
 0x541   :  { %1519 = vmatprep.subr.mxu1 %v863_v16 }
 0x542   :  { %1520 = vmatpush3.msra.mxu1 %v863_v16 }
 0x543   :  { %1521 = vmatprep.subr.mxu1 %v862_v0 }
 0x544   :  { %1522 = vmatpush3.msra.mxu1 %v862_v0 }
 0x545   :  { %1523 = vmatprep.subr.mxu1 %v861_v18 }
 0x546   :  { %1524 = vmatpush3.msra.mxu1 %v861_v18 }
 0x547   :  { %1525 = vmatprep.subr.mxu1 %v860_v20 }
 0x548   :  { %1526 = vmatpush3.msra.mxu1 %v860_v20 }
 0x549   :  { %1527 = vmatprep.subr.mxu1 %v859_v22 }
 0x54a   :  { %1528 = vmatpush3.msra.mxu1 %v859_v22 }
 0x54b   :  { %1529 = vmatprep.subr.mxu1 %v858_v23 }
 0x54c   :  { %1530 = vmatpush3.msra.mxu1 %v858_v23 }
 0x54d   :  { %1531 = vmatprep.subr.mxu1 %v857_v24 }
 0x54e   :  { %1532 = vmatpush3.msra.mxu1 %v857_v24 }
 0x54f   :  { %1533 = vmatprep.subr.mxu1 %v856_v25 }
 0x550   :  { %1534 = vmatpush3.msra.mxu1 %v856_v25 }
 0x551   :  { %1535 = vmatprep.subr.mxu1 %v855_v26 }
 0x552   :  { %1536 = vmatpush3.msra.mxu1 %v855_v26 }
 0x553   :  { %1537 = vmatprep.subr.mxu1 %v854_v27 }
 0x554   :  { %1538 = vmatpush3.msra.mxu1 %v854_v27 }
 0x555   :  { %1539 = vmatprep.subr.mxu1 %v853_v28 }
 0x556   :  { %1540 = vmatpush3.msra.mxu1 %v853_v28 }
 0x557   :  { %1541 = vmatprep.subr.mxu1 %v852_v29 }
 0x558   :  { %1542 = vmatpush3.msra.mxu1 %v852_v29 }
 0x559   :  { %1543 = vmatprep.subr.mxu1 %v851_v30 }
 0x55a   :  { %1544 = vmatpush3.msra.mxu1 %v851_v30 }
 0x55b   :  { %1545 = vmatprep.subr.mxu1 %v850_v31 }
 0x55c   :  { %1546 = vmatpush3.msra.mxu1 %v850_v31 }
 0x55d   :  { %1548 = vmatmul.mubr.f32.vlgmr.msra.gmra.mxu1 %v1951_v59 }
 0x55e   :  { %1550 = vmatprep.mubr.f32.mxu1 %v1989_v1 }
 0x561   :  { %1551 = vmatmul.mubr.f32.gmra.mxu1 %v2028_v11 }
 0x562   :  { %1553 = vmatprep.mubr.f32.mxu1 %v2066_v21 }
 0x565   :  { %1554 = vmatmul.mubr.f32.gmra.mxu1 %v1579_v12 }
 0x5fd   :  { %v760_v33 = vpop.f32.mrf.mxu1 }
 0x5fe   :  { %v764_v34 = vadd.f32 %v760_v33, %v227_v32 }
 0x5ff   :  { %v1479_v35 = vpop.f32.mrf.mxu1 }
 0x600   :  { %1580 = vtanh.f32 %v764_v34 }
 0x60d   :  { %v1581_v36 = vpop.eup %1580 }
 0x60e   :  { %1513 = vmatmul.mubr.f32.vlgmr.msra.gmra.mxu0 %v1581_v36  ;;  %1556 = vmatprep.mubr.f32.mxu1 %v1581_v36 }
 0x61d   :  { %v1549_v38 = vpop.f32.mrf.mxu1 }
 0x61e   :  { %v945_v39 = vadd.f32 %v1549_v38, %v1006_v37 }
 0x61f   :  { %v939_v40 = vpop.f32.mrf.mxu1 }
 0x620   :  { %979 = vst [vmem:[#allocation11 + $0x8] sm:$0xff] %v945_v39  ;;  %v940_v41 = vadd.f32 %v1006_v37, %v939_v40 }
 0x621   :  { %v1552_v42 = vpop.f32.mrf.mxu1 }
 0x622   :  { %978 = vst [vmem:[#allocation11] sm:$0xff] %v940_v41  ;;  %v955_v44 = vadd.f32 %v1552_v42, %v1006_v37 }
 0x623   :  { %v949_v45 = vpop.f32.mrf.mxu1 }
 0x624   :  { %981 = vst [vmem:[#allocation11 + $0x18] sm:$0xff] %v955_v44  ;;  %v950_v46 = vadd.f32 %v1006_v37, %v949_v45 }
 0x625   :  { %v1555_v47 = vpop.f32.mrf.mxu1 }
 0x626   :  { %980 = vst [vmem:[#allocation11 + $0x10] sm:$0xff] %v950_v46  ;;  %v965_v48 = vadd.f32 %v1555_v47, %v1006_v37 }
 0x627   :  { %v959_v49 = vpop.f32.mrf.mxu1 }
 0x628   :  { %983 = vst [vmem:[#allocation11 + $0x28] sm:$0xff] %v965_v48  ;;  %v960_v50 = vadd.f32 %v1006_v37, %v959_v49 }
 0x62a   :  { %982 = vst [vmem:[#allocation11 + $0x20] sm:$0xff] %v960_v50 }
 0x6ce   :  { %v835_v52 = vpop.f32.mrf.mxu0 }
 0x6cf   :  { %v839_v54 = vadd.f32 %v835_v52, %v232_v51 }
 0x6d0   :  { %v1514_v55 = vpop.f32.mrf.mxu0 }
 0x6d1   :  { %1582 = vtanh.f32 %v839_v54 }
 0x6de   :  { %v1583_v56 = vpop.eup %1582 }
 0x6df   :  { %1557 = vmatmul.mubr.f32.gmra.mxu1 %v1583_v56 }
 0x79f   :  { %v1558_v57 = vpop.f32.mrf.mxu1 }
 0x7a0   :  { %v975_v58 = vadd.f32 %v1558_v57, %v1006_v37 }
 0x7a1   :  { %v969_v59 = vpop.f32.mrf.mxu1 }
 0x7a2   :  { %985 = vst [vmem:[#allocation11 + $0x38] sm:$0xff] %v975_v58  ;;  %v970_v60 = vadd.f32 %v1006_v37, %v969_v59 }
 0x7a4   :  { %984 = vst [vmem:[#allocation11 + $0x30] sm:$0xff] %v970_v60 }
 0x7a5   :  { %1675 = shalt.err (!%p1672_p10)
}
 0x7a6   :  { %997 = dma.vmem_to_hbm [thread:$0]  %s992_s18, 1024, %s2128_s6, [#allocation5], %s1694_s26, %s1694_s26, %s1695_s27  }
 0x7a7   :  { %1690 = dma.done.wait [#allocation5], 1024  }
 0x7a8   :  { %1691 = vsyncadd [#allocation5], 4294966272 }
 0x7a9   :  { %1001 = vsyncpa [#allocation4], 1 }
 0x7aa   :  { %1002 = vsyncpa [#allocation7], 1 }
 0x7ab   :  { %1003 = vsyncpa [#allocation10], 1 }
 0x7ac   :  { %1004 = vsyncpa [#allocation5], 1 }

</bundles_post_ra>
